<compile_context>
chip_gen: v5e
topology: v5e:2x2
jax: 0.10.0
libtpu: 0.0.40
codegen_flags: <defaults>
</compile_context>

<pallas_src>
import jax
import jax.numpy as jnp
import numpy as np
from jax.experimental import pallas as pl
from jax.experimental.pallas import tpu as pltpu

EPS = 1e-5


# --------------------------- host-side weight prep ---------------------------
def _band_select(W: int) -> np.ndarray:
    """S[dx, xi, xo] = 1 iff xi == xo + dx - 1 and 0 <= xi < W (zero W-pad)."""
    S = np.zeros((3, W, W), np.float32)
    for dx in range(3):
        for xo in range(W):
            xi = xo + dx - 1
            if 0 <= xi < W:
                S[dx, xi, xo] = 1.0
    return S


def _band_weights(w_hwio, W, out_scale, pack, dtype):
    """(3,3,Cin,Cout) HWIO -> (3, P*W*Cin, P*W*Cout) block-diagonal banded
    (Toeplitz-block) matrices.  The folded BN scale `out_scale` (per Cout) is
    absorbed into the output columns; result cast to `dtype` (bf16 for MXU)."""
    S = jnp.asarray(_band_select(W))
    # band[dy, xi, ci, xo, co] = sum_dx S[dx, xi, xo] * w[dy, dx, ci, co]
    band = jnp.einsum("dio,kdcf->kicof", S, w_hwio)
    band = band * out_scale[None, None, None, None, :]          # fold BN scale
    kh, _, Cin, _, Cout = band.shape
    band = band.reshape(kh, W * Cin, W * Cout)
    if pack > 1:                                   # block-diagonal over P images
        eye_p = jnp.eye(pack, dtype=band.dtype)
        band = jnp.einsum("pq,kab->kpaqb", eye_p, band).reshape(
            kh, pack * W * Cin, pack * W * Cout)
    return band.astype(dtype)


# --------------------------------- kernel ------------------------------------
def _resblock_kernel(x_ref, w1_ref, b1_ref, w2_ref, b2_ref,
                     out_ref, xpad_ref, hpad_ref):
    """One batch-block per grid step.

    x_ref   : (NB, H, L) f32       input block (lane axis = pack * W * C)
    w*_ref  : (3, L, L)  bf16/f32  banded conv weights, BN scale pre-folded
    b*_ref  : (1, L)     f32       folded BN bias
    out_ref : (NB, H, L) f32
    xpad_ref: (NB, H+2, L) f32     scratch: row-padded conv1 input
    hpad_ref: (NB, H+2, L) f32     scratch: row-padded conv1 activation
    """
    NB, H, L = out_ref.shape
    M = NB * H
    mm_dtype = w1_ref.dtype

    # Zero only the halo rows, every step (cheap; safe under "parallel"
    # megacore scheduling -- no reliance on program_id == 0).
    zrow = jnp.zeros((NB, 1, L), jnp.float32)
    xpad_ref[:, 0:1, :] = zrow
    xpad_ref[:, H + 1:H + 2, :] = zrow
    hpad_ref[:, 0:1, :] = zrow
    hpad_ref[:, H + 1:H + 2, :] = zrow

    # Single staging copy of the input into the padded-scratch interior; the
    # residual below reads x_ref directly instead of this scratch.
    xpad_ref[:, 1:H + 1, :] = x_ref[...]

    def conv(pad_ref, w_ref):
        # 3x3 conv == 3 row-shifted banded matmuls, batched over the whole
        # block (M = NB*H rows per dot).  bf16 operands, f32 MXU accumulation.
        acc = jnp.dot(pad_ref[:, 0:H, :].reshape(M, L).astype(mm_dtype),
                      w_ref[0], preferred_element_type=jnp.float32)
        for dy in (1, 2):
            acc += jnp.dot(
                pad_ref[:, dy:dy + H, :].reshape(M, L).astype(mm_dtype),
                w_ref[dy], preferred_element_type=jnp.float32)
        return acc                                              # (M, L) f32

    # conv1 (BN scale folded into weights) -> bias -> ReLU
    h1 = jnp.maximum(conv(xpad_ref, w1_ref) + b1_ref[...], 0.0)
    hpad_ref[:, 1:H + 1, :] = h1.reshape(NB, H, L)

    # conv2 -> bias -> + residual -> ReLU
    y = conv(hpad_ref, w2_ref) + b2_ref[...]
    out_ref[...] = jnp.maximum(y.reshape(NB, H, L) + x_ref[...], 0.0)


# -------------------------------- wrappers -----------------------------------
def resblock_gru_pallas_nhwc(x_nhwc, w1, g1, be1, m1, v1, w2, g2, be2, m2, v2,
                             *, batch_block=None, lane_pack=None,
                             matmul_dtype=jnp.bfloat16):
    """x_nhwc: (N, H, W, C) float32. Conv weights HWIO. Returns (N, H, W, C)."""
    N, H, W, C = x_nhwc.shape
    WC = W * C

    # Lane packing: put P images side by side on the lane axis so the last dim
    # is a multiple of 128.  NOTE: with very small N this can shrink the grid
    # to a single step (idles v7x's second TensorCore) -- override lane_pack /
    # batch_block if >=2 grid steps matter more than lane density.
    if lane_pack is None:
        P = 1
        if WC < 128 and 128 % WC == 0 and N % (128 // WC) == 0:
            P = 128 // WC
    else:
        P = lane_pack
    assert N % P == 0, "lane_pack must divide N"
    NP = N // P
    L = P * WC

    # Fold eval-mode BatchNorm: scale into the banded weight columns, bias
    # stays as a (1, L) in-kernel add.
    def fold(g, b, m, v):
        s = g / jnp.sqrt(v + EPS)
        bias = jnp.tile(b - m * s, P * W).reshape(1, L).astype(jnp.float32)
        return s, bias

    s1, b1 = fold(g1, be1, m1, v1)
    s2, b2 = fold(g2, be2, m2, v2)

    # Banded weights (bf16): conv3x3 == 3 row-shifted (NB*H, L) @ (L, L) dots.
    w1b = _band_weights(w1, W, s1, P, matmul_dtype)
    w2b = _band_weights(w2, W, s2, P, matmul_dtype)

    # Fused (NP, H, L) activation layout (free reshape; packing transpose is a
    # single cheap HBM pass outside the kernel).
    x = x_nhwc.reshape(N, H, WC)
    if P > 1:
        x = x.reshape(NP, P, H, WC).transpose(0, 2, 1, 3).reshape(NP, H, L)

    # Batch block: largest divisor of the packed batch (<= 8) that still leaves
    # a grid of >= 2 steps when possible.
    if batch_block is None:
        NB = 1
        for d in range(1, min(NP, 8) + 1):
            if NP % d == 0 and (NP // d >= 2 or NP == 1):
                NB = d
    else:
        NB = batch_block
    assert NP % NB == 0, "batch_block must divide the packed batch"

    out = pl.pallas_call(
        _resblock_kernel,
        out_shape=jax.ShapeDtypeStruct((NP, H, L), jnp.float32),
        grid_spec=pltpu.PrefetchScalarGridSpec(
            num_scalar_prefetch=0,
            grid=(NP // NB,),
            in_specs=[
                pl.BlockSpec((NB, H, L), lambda i: (i, 0, 0)),
                pl.BlockSpec((3, L, L), lambda i: (0, 0, 0)),
                pl.BlockSpec((1, L), lambda i: (0, 0)),
                pl.BlockSpec((3, L, L), lambda i: (0, 0, 0)),
                pl.BlockSpec((1, L), lambda i: (0, 0)),
            ],
            out_specs=pl.BlockSpec((NB, H, L), lambda i: (i, 0, 0)),
            scratch_shapes=[pltpu.VMEM((NB, H + 2, L), jnp.float32),
                            pltpu.VMEM((NB, H + 2, L), jnp.float32)],
        ),
        compiler_params=pltpu.CompilerParams(
            dimension_semantics=("parallel",)),
    )(x, w1b, b1, w2b, b2)

    # Undo lane packing; final reshape back to NHWC is free in HBM.
    if P > 1:
        out = out.reshape(NP, H, P, WC).transpose(0, 2, 1, 3).reshape(N, H, WC)
    return out.reshape(N, H, W, C)


def resblock_gru_pallas(x_nchw, *params, **kwargs):
    """PyTorch-style NCHW interface.  If the caller can supply NHWC directly,
    call resblock_gru_pallas_nhwc and skip both HBM round-trip transposes."""
    x = jnp.transpose(x_nchw, (0, 2, 3, 1))
    out = resblock_gru_pallas_nhwc(x, *params, **kwargs)
    return jnp.transpose(out, (0, 3, 1, 2))


# ---------------- pure-JAX reference (for correctness check) ----------------
def _ref_resblock(x_nchw, w1, g1, be1, m1, v1, w2, g2, be2, m2, v2):
    x = jnp.transpose(x_nchw, (0, 2, 3, 1))

    def conv(h, w):
        return jax.lax.conv_general_dilated(
            h, w, window_strides=(1, 1), padding="SAME",
            dimension_numbers=("NHWC", "HWIO", "NHWC"))

    def bn(h, g, b, m, v):
        return (h - m) / jnp.sqrt(v + EPS) * g + b

    h = jax.nn.relu(bn(conv(x, w1), g1, be1, m1, v1))
    h = bn(conv(h, w2), g2, be2, m2, v2)
    out = jax.nn.relu(h + x)
    return jnp.transpose(out, (0, 3, 1, 2))


if __name__ == "__main__":
    N, C, H, W = 2, 4, 16, 16
    key = jax.random.PRNGKey(0)
    ks = jax.random.split(key, 11)

    # conv weights (HWIO), bias=False as in the module
    w1 = 0.1 * jax.random.normal(ks[0], (3, 3, C, C), jnp.float32)
    w2 = 0.1 * jax.random.normal(ks[1], (3, 3, C, C), jnp.float32)

    # BatchNorm parameters / running stats (deterministic, non-trivial)
    g1 = 1.0 + 0.1 * jax.random.normal(ks[2], (C,), jnp.float32)
    be1 = 0.1 * jax.random.normal(ks[3], (C,), jnp.float32)
    m1 = 0.1 * jax.random.normal(ks[4], (C,), jnp.float32)
    v1 = jax.random.uniform(ks[5], (C,), jnp.float32, 0.5, 1.5)

    g2 = 1.0 + 0.1 * jax.random.normal(ks[6], (C,), jnp.float32)
    be2 = 0.1 * jax.random.normal(ks[7], (C,), jnp.float32)
    m2 = 0.1 * jax.random.normal(ks[8], (C,), jnp.float32)
    v2 = jax.random.uniform(ks[9], (C,), jnp.float32, 0.5, 1.5)

    x = jax.random.normal(ks[10], (N, C, H, W), jnp.float32)
    params = (w1, g1, be1, m1, v1, w2, g2, be2, m2, v2)

    ref = _ref_resblock(x, *params)

    # Bit-tight semantics check: f32 MXU operands.
    out_f32 = jax.block_until_ready(
        resblock_gru_pallas(x, *params, matmul_dtype=jnp.float32))
    np.testing.assert_allclose(np.asarray(out_f32), np.asarray(ref),
                               rtol=1e-4, atol=1e-4)

    # Performance default: bf16 MXU operands, f32 accumulation (looser
    # tolerance reflects bf16 operand rounding only; accumulation stays f32).
    out_bf16 = jax.block_until_ready(resblock_gru_pallas(x, *params))
    np.testing.assert_allclose(np.asarray(out_bf16), np.asarray(ref),
                               rtol=5e-2, atol=5e-2)

    print("KERNEL_OK")
</pallas_src>

<mosaic_0001>
module attributes {stable_mosaic.version = 11 : i64} {
  func.func @_resblock_kernel(%arg0: i32, %arg1: memref<1x16x128xf32, #tpu.memory_space<vmem>>, %arg2: memref<3x128x128xf32, #tpu.memory_space<vmem>>, %arg3: memref<1x128xf32, #tpu.memory_space<vmem>>, %arg4: memref<3x128x128xf32, #tpu.memory_space<vmem>>, %arg5: memref<1x128xf32, #tpu.memory_space<vmem>>, %arg6: memref<1x16x128xf32, #tpu.memory_space<vmem>>, %arg7: memref<1x18x128xf32, #tpu.memory_space<vmem>>, %arg8: memref<1x18x128xf32, #tpu.memory_space<vmem>>) attributes {dimension_semantics = [#tpu.dimension_semantics<parallel>], iteration_bounds = array<i64: 1>, scalar_prefetch = 0 : i64, scratch_operands = 2 : i64, tpu.core_type = #tpu.core_type<tc>, window_params = [{transform_indices = @transform_0, window_bounds = array<i64: 1, 16, 128>}, {pipeline_mode = #tpu.pipeline_mode<synchronous>, transform_indices = @transform_1, window_bounds = array<i64: 3, 128, 128>}, {pipeline_mode = #tpu.pipeline_mode<synchronous>, transform_indices = @transform_2, window_bounds = array<i64: 1, 128>}, {pipeline_mode = #tpu.pipeline_mode<synchronous>, transform_indices = @transform_3, window_bounds = array<i64: 3, 128, 128>}, {pipeline_mode = #tpu.pipeline_mode<synchronous>, transform_indices = @transform_4, window_bounds = array<i64: 1, 128>}, {transform_indices = @transform_5, window_bounds = array<i64: 1, 16, 128>}]} {
    %cst = arith.constant 0.000000e+00 : f32
    %0 = vector.broadcast %cst : f32 to vector<1x1x128xf32>
    %c0 = arith.constant 0 : index
    %c0_0 = arith.constant 0 : index
    %c0_1 = arith.constant 0 : index
    %1 = vector.load %arg7[%c0, %c0_0, %c0_1] : memref<1x18x128xf32, #tpu.memory_space<vmem>>, vector<1x1x128xf32>
    tpu.vector_store %arg7[%c0, %c0_0, %c0_1], %0 {strides = array<i32>} : memref<1x18x128xf32, #tpu.memory_space<vmem>>, vector<1x1x128xf32>,
    %c0_2 = arith.constant 0 : index
    %c17 = arith.constant 17 : index
    %c0_3 = arith.constant 0 : index
    %2 = vector.load %arg7[%c0_2, %c17, %c0_3] : memref<1x18x128xf32, #tpu.memory_space<vmem>>, vector<1x1x128xf32>
    tpu.vector_store %arg7[%c0_2, %c17, %c0_3], %0 {strides = array<i32>} : memref<1x18x128xf32, #tpu.memory_space<vmem>>, vector<1x1x128xf32>,
    %c0_4 = arith.constant 0 : index
    %c0_5 = arith.constant 0 : index
    %c0_6 = arith.constant 0 : index
    %3 = vector.load %arg8[%c0_4, %c0_5, %c0_6] : memref<1x18x128xf32, #tpu.memory_space<vmem>>, vector<1x1x128xf32>
    tpu.vector_store %arg8[%c0_4, %c0_5, %c0_6], %0 {strides = array<i32>} : memref<1x18x128xf32, #tpu.memory_space<vmem>>, vector<1x1x128xf32>,
    %c0_7 = arith.constant 0 : index
    %c17_8 = arith.constant 17 : index
    %c0_9 = arith.constant 0 : index
    %4 = vector.load %arg8[%c0_7, %c17_8, %c0_9] : memref<1x18x128xf32, #tpu.memory_space<vmem>>, vector<1x1x128xf32>
    tpu.vector_store %arg8[%c0_7, %c17_8, %c0_9], %0 {strides = array<i32>} : memref<1x18x128xf32, #tpu.memory_space<vmem>>, vector<1x1x128xf32>,
    %c0_10 = arith.constant 0 : index
    %c0_11 = arith.constant 0 : index
    %c0_12 = arith.constant 0 : index
    %5 = vector.load %arg1[%c0_10, %c0_11, %c0_12] : memref<1x16x128xf32, #tpu.memory_space<vmem>>, vector<1x16x128xf32>
    %c0_13 = arith.constant 0 : index
    %c1 = arith.constant 1 : index
    %c0_14 = arith.constant 0 : index
    %6 = vector.load %arg7[%c0_13, %c1, %c0_14] : memref<1x18x128xf32, #tpu.memory_space<vmem>>, vector<1x16x128xf32>
    tpu.vector_store %arg7[%c0_13, %c1, %c0_14], %5 {strides = array<i32>} : memref<1x18x128xf32, #tpu.memory_space<vmem>>, vector<1x16x128xf32>,
    %c0_15 = arith.constant 0 : index
    %c0_16 = arith.constant 0 : index
    %c0_17 = arith.constant 0 : index
    %7 = vector.load %arg7[%c0_15, %c0_16, %c0_17] : memref<1x18x128xf32, #tpu.memory_space<vmem>>, vector<1x16x128xf32>
    %8 = vector.shape_cast %7 : vector<1x16x128xf32> to vector<16x128xf32>
    %c0_18 = arith.constant 0 : index
    %c0_19 = arith.constant 0 : index
    %c0_20 = arith.constant 0 : index
    %9 = vector.load %arg2[%c0_18, %c0_19, %c0_20] : memref<3x128x128xf32, #tpu.memory_space<vmem>>, vector<1x128x128xf32>
    %10 = vector.shape_cast %9 : vector<1x128x128xf32> to vector<128x128xf32>
    %cst_21 = arith.constant dense<0.000000e+00> : vector<16x128xf32>
    %11 = tpu.matmul %8, %10, %cst_21 {dimension_numbers = #tpu.dot_dimension_numbers<[1], [0], [0], [1], [0, 0, 1, 1], [], []>} : vector<16x128xf32>, vector<128x128xf32>, vector<16x128xf32> -> vector<16x128xf32>
    %c0_22 = arith.constant 0 : index
    %c1_23 = arith.constant 1 : index
    %c0_24 = arith.constant 0 : index
    %12 = vector.load %arg7[%c0_22, %c1_23, %c0_24] : memref<1x18x128xf32, #tpu.memory_space<vmem>>, vector<1x16x128xf32>
    %13 = vector.shape_cast %12 : vector<1x16x128xf32> to vector<16x128xf32>
    %c1_25 = arith.constant 1 : index
    %c0_26 = arith.constant 0 : index
    %c0_27 = arith.constant 0 : index
    %14 = vector.load %arg2[%c1_25, %c0_26, %c0_27] : memref<3x128x128xf32, #tpu.memory_space<vmem>>, vector<1x128x128xf32>
    %15 = vector.shape_cast %14 : vector<1x128x128xf32> to vector<128x128xf32>
    %cst_28 = arith.constant dense<0.000000e+00> : vector<16x128xf32>
    %16 = tpu.matmul %13, %15, %cst_28 {dimension_numbers = #tpu.dot_dimension_numbers<[1], [0], [0], [1], [0, 0, 1, 1], [], []>} : vector<16x128xf32>, vector<128x128xf32>, vector<16x128xf32> -> vector<16x128xf32>
    %17 = arith.addf %11, %16 : vector<16x128xf32>
    %c0_29 = arith.constant 0 : index
    %c2 = arith.constant 2 : index
    %c0_30 = arith.constant 0 : index
    %18 = vector.load %arg7[%c0_29, %c2, %c0_30] : memref<1x18x128xf32, #tpu.memory_space<vmem>>, vector<1x16x128xf32>
    %19 = vector.shape_cast %18 : vector<1x16x128xf32> to vector<16x128xf32>
    %c2_31 = arith.constant 2 : index
    %c0_32 = arith.constant 0 : index
    %c0_33 = arith.constant 0 : index
    %20 = vector.load %arg2[%c2_31, %c0_32, %c0_33] : memref<3x128x128xf32, #tpu.memory_space<vmem>>, vector<1x128x128xf32>
    %21 = vector.shape_cast %20 : vector<1x128x128xf32> to vector<128x128xf32>
    %cst_34 = arith.constant dense<0.000000e+00> : vector<16x128xf32>
    %22 = tpu.matmul %19, %21, %cst_34 {dimension_numbers = #tpu.dot_dimension_numbers<[1], [0], [0], [1], [0, 0, 1, 1], [], []>} : vector<16x128xf32>, vector<128x128xf32>, vector<16x128xf32> -> vector<16x128xf32>
    %23 = arith.addf %17, %22 : vector<16x128xf32>
    %c0_35 = arith.constant 0 : index
    %c0_36 = arith.constant 0 : index
    %24 = vector.load %arg3[%c0_35, %c0_36] : memref<1x128xf32, #tpu.memory_space<vmem>>, vector<1x128xf32>
    %25 = vector.broadcast %24 : vector<1x128xf32> to vector<16x128xf32>
    %26 = arith.addf %23, %25 : vector<16x128xf32>
    %cst_37 = arith.constant 0.000000e+00 : f32
    %27 = vector.broadcast %cst_37 : f32 to vector<16x128xf32>
    %28 = arith.maximumf %26, %27 : vector<16x128xf32>
    %29 = vector.shape_cast %28 : vector<16x128xf32> to vector<1x16x128xf32>
    %c0_38 = arith.constant 0 : index
    %c1_39 = arith.constant 1 : index
    %c0_40 = arith.constant 0 : index
    %30 = vector.load %arg8[%c0_38, %c1_39, %c0_40] : memref<1x18x128xf32, #tpu.memory_space<vmem>>, vector<1x16x128xf32>
    tpu.vector_store %arg8[%c0_38, %c1_39, %c0_40], %29 {strides = array<i32>} : memref<1x18x128xf32, #tpu.memory_space<vmem>>, vector<1x16x128xf32>,
    %c0_41 = arith.constant 0 : index
    %c0_42 = arith.constant 0 : index
    %c0_43 = arith.constant 0 : index
    %31 = vector.load %arg8[%c0_41, %c0_42, %c0_43] : memref<1x18x128xf32, #tpu.memory_space<vmem>>, vector<1x16x128xf32>
    %32 = vector.shape_cast %31 : vector<1x16x128xf32> to vector<16x128xf32>
    %c0_44 = arith.constant 0 : index
    %c0_45 = arith.constant 0 : index
    %c0_46 = arith.constant 0 : index
    %33 = vector.load %arg4[%c0_44, %c0_45, %c0_46] : memref<3x128x128xf32, #tpu.memory_space<vmem>>, vector<1x128x128xf32>
    %34 = vector.shape_cast %33 : vector<1x128x128xf32> to vector<128x128xf32>
    %cst_47 = arith.constant dense<0.000000e+00> : vector<16x128xf32>
    %35 = tpu.matmul %32, %34, %cst_47 {dimension_numbers = #tpu.dot_dimension_numbers<[1], [0], [0], [1], [0, 0, 1, 1], [], []>} : vector<16x128xf32>, vector<128x128xf32>, vector<16x128xf32> -> vector<16x128xf32>
    %c0_48 = arith.constant 0 : index
    %c1_49 = arith.constant 1 : index
    %c0_50 = arith.constant 0 : index
    %36 = vector.load %arg8[%c0_48, %c1_49, %c0_50] : memref<1x18x128xf32, #tpu.memory_space<vmem>>, vector<1x16x128xf32>
    %37 = vector.shape_cast %36 : vector<1x16x128xf32> to vector<16x128xf32>
    %c1_51 = arith.constant 1 : index
    %c0_52 = arith.constant 0 : index
    %c0_53 = arith.constant 0 : index
    %38 = vector.load %arg4[%c1_51, %c0_52, %c0_53] : memref<3x128x128xf32, #tpu.memory_space<vmem>>, vector<1x128x128xf32>
    %39 = vector.shape_cast %38 : vector<1x128x128xf32> to vector<128x128xf32>
    %cst_54 = arith.constant dense<0.000000e+00> : vector<16x128xf32>
    %40 = tpu.matmul %37, %39, %cst_54 {dimension_numbers = #tpu.dot_dimension_numbers<[1], [0], [0], [1], [0, 0, 1, 1], [], []>} : vector<16x128xf32>, vector<128x128xf32>, vector<16x128xf32> -> vector<16x128xf32>
    %41 = arith.addf %35, %40 : vector<16x128xf32>
    %c0_55 = arith.constant 0 : index
    %c2_56 = arith.constant 2 : index
    %c0_57 = arith.constant 0 : index
    %42 = vector.load %arg8[%c0_55, %c2_56, %c0_57] : memref<1x18x128xf32, #tpu.memory_space<vmem>>, vector<1x16x128xf32>
    %43 = vector.shape_cast %42 : vector<1x16x128xf32> to vector<16x128xf32>
    %c2_58 = arith.constant 2 : index
    %c0_59 = arith.constant 0 : index
    %c0_60 = arith.constant 0 : index
    %44 = vector.load %arg4[%c2_58, %c0_59, %c0_60] : memref<3x128x128xf32, #tpu.memory_space<vmem>>, vector<1x128x128xf32>
    %45 = vector.shape_cast %44 : vector<1x128x128xf32> to vector<128x128xf32>
    %cst_61 = arith.constant dense<0.000000e+00> : vector<16x128xf32>
    %46 = tpu.matmul %43, %45, %cst_61 {dimension_numbers = #tpu.dot_dimension_numbers<[1], [0], [0], [1], [0, 0, 1, 1], [], []>} : vector<16x128xf32>, vector<128x128xf32>, vector<16x128xf32> -> vector<16x128xf32>
    %47 = arith.addf %41, %46 : vector<16x128xf32>
    %c0_62 = arith.constant 0 : index
    %c0_63 = arith.constant 0 : index
    %48 = vector.load %arg5[%c0_62, %c0_63] : memref<1x128xf32, #tpu.memory_space<vmem>>, vector<1x128xf32>
    %49 = vector.broadcast %48 : vector<1x128xf32> to vector<16x128xf32>
    %50 = arith.addf %47, %49 : vector<16x128xf32>
    %51 = vector.shape_cast %50 : vector<16x128xf32> to vector<1x16x128xf32>
    %c0_64 = arith.constant 0 : index
    %c0_65 = arith.constant 0 : index
    %c0_66 = arith.constant 0 : index
    %52 = vector.load %arg1[%c0_64, %c0_65, %c0_66] : memref<1x16x128xf32, #tpu.memory_space<vmem>>, vector<1x16x128xf32>
    %53 = arith.addf %51, %52 : vector<1x16x128xf32>
    %cst_67 = arith.constant 0.000000e+00 : f32
    %54 = vector.broadcast %cst_67 : f32 to vector<1x16x128xf32>
    %55 = arith.maximumf %53, %54 : vector<1x16x128xf32>
    %c0_68 = arith.constant 0 : index
    %c0_69 = arith.constant 0 : index
    %c0_70 = arith.constant 0 : index
    %56 = vector.load %arg6[%c0_68, %c0_69, %c0_70] : memref<1x16x128xf32, #tpu.memory_space<vmem>>, vector<1x16x128xf32>
    tpu.vector_store %arg6[%c0_68, %c0_69, %c0_70], %55 {strides = array<i32>} : memref<1x16x128xf32, #tpu.memory_space<vmem>>, vector<1x16x128xf32>,
    return
  }
  func.func @transform_0(%arg0: i32) -> (i32, i32, i32) {
    %c0_i32 = arith.constant 0 : i32
    %c0_i32_0 = arith.constant 0 : i32
    %c0_i32_1 = arith.constant 0 : i32
    return %arg0, %c0_i32, %c0_i32_0 : i32, i32, i32
  }
  func.func @transform_1(%arg0: i32) -> (i32, i32, i32) {
    %c0_i32 = arith.constant 0 : i32
    %c0_i32_0 = arith.constant 0 : i32
    %c0_i32_1 = arith.constant 0 : i32
    %c0_i32_2 = arith.constant 0 : i32
    return %c0_i32, %c0_i32_0, %c0_i32_1 : i32, i32, i32
  }
  func.func @transform_2(%arg0: i32) -> (i32, i32) {
    %c0_i32 = arith.constant 0 : i32
    %c0_i32_0 = arith.constant 0 : i32
    %c0_i32_1 = arith.constant 0 : i32
    return %c0_i32, %c0_i32_0 : i32, i32
  }
  func.func @transform_3(%arg0: i32) -> (i32, i32, i32) {
    %c0_i32 = arith.constant 0 : i32
    %c0_i32_0 = arith.constant 0 : i32
    %c0_i32_1 = arith.constant 0 : i32
    %c0_i32_2 = arith.constant 0 : i32
    return %c0_i32, %c0_i32_0, %c0_i32_1 : i32, i32, i32
  }
  func.func @transform_4(%arg0: i32) -> (i32, i32) {
    %c0_i32 = arith.constant 0 : i32
    %c0_i32_0 = arith.constant 0 : i32
    %c0_i32_1 = arith.constant 0 : i32
    return %c0_i32, %c0_i32_0 : i32, i32
  }
  func.func @transform_5(%arg0: i32) -> (i32, i32, i32) {
    %c0_i32 = arith.constant 0 : i32
    %c0_i32_0 = arith.constant 0 : i32
    %c0_i32_1 = arith.constant 0 : i32
    return %arg0, %c0_i32, %c0_i32_0 : i32, i32, i32
  }
}

</mosaic_0001>

<bundles_post_ra>
// kernel: tpu_custom_call.1
= control target key start
LH: loop header
LB: loop body
LE: loop exit
PB: predicated region body
PF: predicated region fallthrough
CT: control target
= control target key end

     0   :  { %10 = vsyncpa [#allocation5], 0  ;;  %s594_s0 = inlined_call_operand.hbm [shape: f32[1,16,128], index: 0, kind: input, shape index: {}]   ;;  %s595_s1 = inlined_call_operand.hbm [shape: f32[3,128,128], index: 1, kind: input, shape index: {}]   ;;  %s596_s2 = inlined_call_operand.vmem [shape: f32[1,128], index: 2, kind: input, shape index: {}]   ;;  %s597_s3 = inlined_call_operand.hbm [shape: f32[3,128,128], index: 3, kind: input, shape index: {}]   ;;  %s598_s4 = inlined_call_operand.vmem [shape: f32[1,128], index: 4, kind: input, shape index: {}]   ;;  %s599_s5 = inlined_call_operand.hbm [shape: f32[1,16,128], index: 5, kind: output, shape index: {}]  }
   0x1   :  { %11 = vsyncpa [#allocation8], 0 }
   0x2   :  { %12 = vsyncpa [#allocation6], 0  ;;  %s30_s20 = sshll.u32 %s595_s1, 4  ;;  %s517_s21 = smov [#allocation7]   ;;  %s31_s20 = int_to_ptr.hbm [resolvable:$true] %s30_s20 }
   0x3   :  { %s32_s22 = sshll.u32 %s517_s21, 4  ;;  %s17_s25 = sshll.u32 %s594_s0, 4  ;;  %s33_s22 = int_to_ptr.vmem [resolvable:$true] %s32_s22  ;;  %s18_s25 = int_to_ptr.hbm [resolvable:$true] %s17_s25 }
   0x4   :  { %s518_s26 = smov 128   ;;  %s519_s27 = smov 8  }
   0x5   :  { %38 = dma.hbm_to_vmem [thread:$0]  %s31_s20, 6144, %s33_s22, [#allocation8], %s518_s26, %s518_s26, %s519_s27  }
   0x6   :  { %s520_s28 = smov [#allocation4]   ;;  %s45_s1 = sshll.u32 %s597_s3, 4  ;;  %s46_s1 = int_to_ptr.hbm [resolvable:$true] %s45_s1 }
   0x7   :  { %s19_s29 = sshll.u32 %s520_s28, 4  ;;  %s521_s0 = smov [#allocation9]   ;;  %s20_s29 = int_to_ptr.vmem [resolvable:$true] %s19_s29 }
   0x8   :  { %25 = dma.hbm_to_vmem [thread:$0]  %s18_s25, 256, %s20_s29, [#allocation5], %s518_s26, %s518_s26, %s519_s27  }
   0x9   :  { %s47_s7 = sshll.u32 %s521_s0, 4  ;;  %s48_s7 = int_to_ptr.vmem [resolvable:$true] %s47_s7 }
   0xa   :  { %53 = dma.hbm_to_vmem [thread:$0]  %s46_s1, 6144, %s48_s7, [#allocation8], %s518_s26, %s518_s26, %s519_s27  }
   0xb   :  { %511 = dma.done.wait [#allocation5], 256  }
   0xc   :  { %512 = vsyncadd [#allocation5], 4294967040 }
   0xd   :  { %513 = dma.done.wait [#allocation8], 12288  }
   0xe   :  { %514 = vsyncadd [#allocation8], 4294955008  ;;  %v522_v0 = vmov 0.0   ;;  %v177_v1 = vld [vmem:[#allocation7 + $0x178] sm:$0xff]  ;;  %v176_v2 = vld [vmem:[#allocation7 + $0x170] sm:$0xff]  ;;  %s523_s10 = smov [#allocation10]  }
   0xf   :  { %68 = vst [vmem:[#allocation2] sm:$0x1] %v522_v0  ;;  %v112_v3 = vld [vmem:[#allocation7 + $0xf8] sm:$0xff]  ;;  %178 = vmatpush.msra.mxu2 %v177_v1  ;;  %v111_v5 = vld [vmem:[#allocation7 + $0xf0] sm:$0xff]  ;;  %v175_v6 = vld [vmem:[#allocation7 + $0x168] sm:$0xff]  ;;  %s358_s11 = sshll.u32 %s523_s10, 4  ;;  %s359_s11 = int_to_ptr.vmem [resolvable:$true] %s358_s11 }
  0x10   :  { %69 = vst [vmem:[#allocation2 + $0x11] sm:$0x1] %v522_v0  ;;  %113 = vmatpush.msra.mxu0 %v112_v3  ;;  %v93_v4 = vld [vmem:[#allocation7 + $0x78] sm:$0xff]  ;;  %v92_v7 = vld [vmem:[#allocation7 + $0x70] sm:$0xff]  ;;  %v110_v8 = vld [vmem:[#allocation7 + $0xe8] sm:$0xff]  ;;  %s360_s14 = sshll.u32 %s599_s5, 4  ;;  %s361_s14 = int_to_ptr.hbm [resolvable:$true] %s360_s14 }
  0x11   :  { %70 = vst [vmem:[#allocation3] sm:$0x1] %v522_v0  ;;  %136 = vmatpush.msra.mxu1 %v93_v4  ;;  %179 = vmatpush.msra.mxu2 %v176_v2  ;;  %v91_v9 = vld [vmem:[#allocation7 + $0x68] sm:$0xff]  ;;  %v174_v10 = vld [vmem:[#allocation7 + $0x160] sm:$0xff]  ;;  %v173_v13 = vld [vmem:[#allocation7 + $0x158] sm:$0xff] }
  0x12   :  { %71 = vst [vmem:[#allocation3 + $0x11] sm:$0x1] %v522_v0  ;;  %114 = vmatpush.msra.mxu0 %v111_v5  ;;  %v109_v11 = vld [vmem:[#allocation7 + $0xe0] sm:$0xff]  ;;  %v108_v14 = vld [vmem:[#allocation7 + $0xd8] sm:$0xff]  ;;  %v172_v16 = vld [vmem:[#allocation7 + $0x150] sm:$0xff] }
  0x13   :  { %137 = vmatpush.msra.mxu1 %v92_v7  ;;  %180 = vmatpush.msra.mxu2 %v175_v6  ;;  %v90_v12 = vld [vmem:[#allocation7 + $0x60] sm:$0xff]  ;;  %v89_v15 = vld [vmem:[#allocation7 + $0x58] sm:$0xff]  ;;  %v107_v17 = vld [vmem:[#allocation7 + $0xd0] sm:$0xff] }
  0x14   :  { %115 = vmatpush.msra.mxu0 %v110_v8  ;;  %v88_v18 = vld [vmem:[#allocation7 + $0x50] sm:$0xff]  ;;  %v171_v19 = vld [vmem:[#allocation7 + $0x148] sm:$0xff]  ;;  %v170_v22 = vld [vmem:[#allocation7 + $0x140] sm:$0xff] }
  0x15   :  { %138 = vmatpush.msra.mxu1 %v91_v9  ;;  %181 = vmatpush.msra.mxu2 %v174_v10  ;;  %v106_v20 = vld [vmem:[#allocation7 + $0xc8] sm:$0xff]  ;;  %v105_v23 = vld [vmem:[#allocation7 + $0xc0] sm:$0xff]  ;;  %v169_v25 = vld [vmem:[#allocation7 + $0x138] sm:$0xff] }
  0x16   :  { %116 = vmatpush.msra.mxu0 %v109_v11  ;;  %v87_v21 = vld [vmem:[#allocation7 + $0x48] sm:$0xff]  ;;  %v86_v24 = vld [vmem:[#allocation7 + $0x40] sm:$0xff]  ;;  %v104_v26 = vld [vmem:[#allocation7 + $0xb8] sm:$0xff] }
  0x17   :  { %139 = vmatpush.msra.mxu1 %v90_v12  ;;  %182 = vmatpush.msra.mxu2 %v173_v13  ;;  %v572_v27 = vld [vmem:[#allocation4] sm:$0xff]  ;;  %v85_v28 = vld [vmem:[#allocation7 + $0x38] sm:$0xff]  ;;  %v167_v35 = vld [vmem:[#allocation7 + $0x128] sm:$0xff] }
  0x18   :  { %117 = vmatpush.msra.mxu0 %v108_v14  ;;  %v574_v29 = vld [vmem:[#allocation4 + $0x8] sm:$0xff]  ;;  %74 = vst [vmem:[#allocation2 + $0x1] sm:$0xff] %v572_v27  ;;  %v168_v30 = vld [vmem:[#allocation7 + $0x130] sm:$0xff]  ;;  %v102_v36 = vld [vmem:[#allocation7 + $0xa8] sm:$0xff] }
  0x19   :  { %140 = vmatpush.msra.mxu1 %v89_v15  ;;  %183 = vmatpush.msra.mxu2 %v172_v16  ;;  %v103_v31 = vld [vmem:[#allocation7 + $0xb0] sm:$0xff]  ;;  %75 = vst [vmem:[#allocation2 + $0x9] sm:$0xff] %v574_v29  ;;  %v249_v32 = vld [vmem:[#allocation9 + $0xf8] sm:$0xff]  ;;  %v83_v37 = vld [vmem:[#allocation7 + $0x28] sm:$0xff] }
  0x1a   :  { %118 = vmatpush.msra.mxu0 %v107_v17  ;;  %v84_v33 = vld [vmem:[#allocation7 + $0x30] sm:$0xff]  ;;  %250 = vmatpush.msra.mxu3 %v249_v32  ;;  %v247_v38 = vld [vmem:[#allocation9 + $0xe8] sm:$0xff]  ;;  %v166_v39 = vld [vmem:[#allocation7 + $0x120] sm:$0xff] }
  0x1b   :  { %141 = vmatpush.msra.mxu1 %v88_v18  ;;  %184 = vmatpush.msra.mxu2 %v171_v19  ;;  %v248_v34 = vld [vmem:[#allocation9 + $0xf0] sm:$0xff]  ;;  %v101_v40 = vld [vmem:[#allocation7 + $0xa0] sm:$0xff]  ;;  %v165_v43 = vld [vmem:[#allocation7 + $0x118] sm:$0xff] }
  0x1c   :  { %119 = vmatpush.msra.mxu0 %v106_v20  ;;  %251 = vmatpush.msra.mxu3 %v248_v34  ;;  %v82_v41 = vld [vmem:[#allocation7 + $0x20] sm:$0xff]  ;;  %v100_v44 = vld [vmem:[#allocation7 + $0x98] sm:$0xff]  ;;  %v164_v47 = vld [vmem:[#allocation7 + $0x110] sm:$0xff] }
  0x1d   :  { %142 = vmatpush.msra.mxu1 %v87_v21  ;;  %185 = vmatpush.msra.mxu2 %v170_v22  ;;  %v246_v42 = vld [vmem:[#allocation9 + $0xe0] sm:$0xff]  ;;  %v81_v45 = vld [vmem:[#allocation7 + $0x18] sm:$0xff]  ;;  %v99_v48 = vld [vmem:[#allocation7 + $0x90] sm:$0xff] }
  0x1e   :  { %120 = vmatpush.msra.mxu0 %v105_v23  ;;  %252 = vmatpush.msra.mxu3 %v247_v38  ;;  %v245_v46 = vld [vmem:[#allocation9 + $0xd8] sm:$0xff]  ;;  %v163_v49 = vld [vmem:[#allocation7 + $0x108] sm:$0xff]  ;;  %v80_v50 = vld [vmem:[#allocation7 + $0x10] sm:$0xff] }
  0x1f   :  { %143 = vmatpush.msra.mxu1 %v86_v24  ;;  %186 = vmatpush.msra.mxu2 %v169_v25  ;;  %v244_v51 = vld [vmem:[#allocation9 + $0xd0] sm:$0xff]  ;;  %v98_v52 = vld [vmem:[#allocation7 + $0x88] sm:$0xff]  ;;  %v162_v55 = vld [vmem:[#allocation7 + $0x100] sm:$0xff] }
  0x20   :  { %121 = vmatpush.msra.mxu0 %v104_v26  ;;  %253 = vmatpush.msra.mxu3 %v246_v42  ;;  %v79_v53 = vld [vmem:[#allocation7 + $0x8] sm:$0xff]  ;;  %v97_v56 = vld [vmem:[#allocation7 + $0x80] sm:$0xff]  ;;  %v230_v61 = vld [vmem:[#allocation9 + $0x78] sm:$0xff] }
  0x21   :  { %144 = vmatpush.msra.mxu1 %v85_v28  ;;  %187 = vmatpush.msra.mxu2 %v168_v30  ;;  %v243_v54 = vld [vmem:[#allocation9 + $0xc8] sm:$0xff]  ;;  %v78_v58 = vld [vmem:[#allocation7] sm:$0xff]  ;;  %v314_v62 = vld [vmem:[#allocation9 + $0x178] sm:$0xff] }
  0x22   :  { %122 = vmatpush.msra.mxu0 %v103_v31  ;;  %254 = vmatpush.msra.mxu3 %v245_v46  ;;  %v159_v57 = vld [vmem:[#allocation2 + $0x2] sm:$0xff]  ;;  %v241_v63 = vld [vmem:[#allocation9 + $0xb8] sm:$0xff]  ;;  %v229_v0 = vld [vmem:[#allocation9 + $0x70] sm:$0xff] }
  0x23   :  { %145 = vmatpush.msra.mxu1 %v84_v33  ;;  %188 = vmatpush.msra.mxu2 %v167_v35  ;;  %v76_v59 = vld [vmem:[#allocation2] sm:$0xff]  ;;  %v313_v1 = vld [vmem:[#allocation9 + $0x170] sm:$0xff]  ;;  %v228_v3 = vld [vmem:[#allocation9 + $0x68] sm:$0xff] }
  0x24   :  { %123 = vmatpush.msra.mxu0 %v102_v36  ;;  %255 = vmatpush.msra.mxu3 %v244_v51  ;;  %v242_v60 = vld [vmem:[#allocation9 + $0xc0] sm:$0xff]  ;;  %v240_v2 = vld [vmem:[#allocation9 + $0xb0] sm:$0xff]  ;;  %v312_v4 = vld [vmem:[#allocation9 + $0x168] sm:$0xff] }
  0x25   :  { %146 = vmatpush.msra.mxu1 %v83_v37  ;;  %189 = vmatpush.msra.mxu2 %v166_v39  ;;  %v160_v5 = vld [vmem:[#allocation2 + $0xa] sm:$0xff]  ;;  %v227_v8 = vld [vmem:[#allocation9 + $0x60] sm:$0xff]  ;;  %v226_v10 = vld [vmem:[#allocation9 + $0x58] sm:$0xff] }
  0x26   :  { %124 = vmatpush.msra.mxu0 %v101_v40  ;;  %256 = vmatpush.msra.mxu3 %v243_v54  ;;  %v239_v6 = vld [vmem:[#allocation9 + $0xa8] sm:$0xff]  ;;  %v238_v9 = vld [vmem:[#allocation9 + $0xa0] sm:$0xff]  ;;  %v237_v11 = vld [vmem:[#allocation9 + $0x98] sm:$0xff] }
  0x27   :  { %147 = vmatpush.msra.mxu1 %v82_v41  ;;  %190 = vmatpush.msra.mxu2 %v165_v43  ;;  %v77_v7 = vld [vmem:[#allocation2 + $0x8] sm:$0xff]  ;;  %v225_v12 = vld [vmem:[#allocation9 + $0x50] sm:$0xff]  ;;  %v234_v16 = vld [vmem:[#allocation9 + $0x80] sm:$0xff] }
  0x28   :  { %125 = vmatpush.msra.mxu0 %v100_v44  ;;  %257 = vmatpush.msra.mxu3 %v242_v60  ;;  %v236_v13 = vld [vmem:[#allocation9 + $0x90] sm:$0xff]  ;;  %v224_v14 = vld [vmem:[#allocation9 + $0x48] sm:$0xff]  ;;  %v223_v17 = vld [vmem:[#allocation9 + $0x40] sm:$0xff] }
  0x29   :  { %148 = vmatpush.msra.mxu1 %v81_v45  ;;  %191 = vmatpush.msra.mxu2 %v164_v47  ;;  %v235_v15 = vld [vmem:[#allocation9 + $0x88] sm:$0xff]  ;;  %v311_v18 = vld [vmem:[#allocation9 + $0x160] sm:$0xff]  ;;  %v222_v19 = vld [vmem:[#allocation9 + $0x38] sm:$0xff] }
  0x2a   :  { %126 = vmatpush.msra.mxu0 %v99_v48  ;;  %258 = vmatpush.msra.mxu3 %v241_v63  ;;  %v310_v20 = vld [vmem:[#allocation9 + $0x158] sm:$0xff]  ;;  %v221_v21 = vld [vmem:[#allocation9 + $0x30] sm:$0xff]  ;;  %v220_v23 = vld [vmem:[#allocation9 + $0x28] sm:$0xff] }
  0x2b   :  { %149 = vmatpush.msra.mxu1 %v80_v50  ;;  %192 = vmatpush.msra.mxu2 %v163_v49  ;;  %v309_v22 = vld [vmem:[#allocation9 + $0x150] sm:$0xff]  ;;  %v308_v24 = vld [vmem:[#allocation9 + $0x148] sm:$0xff]  ;;  %v219_v25 = vld [vmem:[#allocation9 + $0x20] sm:$0xff] }
  0x2c   :  { %127 = vmatpush.msra.mxu0 %v98_v52  ;;  %259 = vmatpush.msra.mxu3 %v240_v2  ;;  %v307_v26 = vld [vmem:[#allocation9 + $0x140] sm:$0xff]  ;;  %v218_v28 = vld [vmem:[#allocation9 + $0x18] sm:$0xff]  ;;  %v217_v31 = vld [vmem:[#allocation9 + $0x10] sm:$0xff] }
  0x2d   :  { %150 = vmatpush.msra.mxu1 %v79_v53  ;;  %193 = vmatpush.msra.mxu2 %v162_v55  ;;  %v306_v30 = vld [vmem:[#allocation9 + $0x138] sm:$0xff]  ;;  %v305_v32 = vld [vmem:[#allocation9 + $0x130] sm:$0xff]  ;;  %v216_v33 = vld [vmem:[#allocation9 + $0x8] sm:$0xff] }
  0x2e   :  { %128 = vmatpush.msra.mxu0 %v97_v56  ;;  %194 = vmatmul.f32.vlgmr.msra.gmra.mxu2 %v159_v57  ;;  %v304_v34 = vld [vmem:[#allocation9 + $0x128] sm:$0xff]  ;;  %v215_v35 = vld [vmem:[#allocation9] sm:$0xff]  ;;  %v302_v37 = vld [vmem:[#allocation9 + $0x118] sm:$0xff] }
  0x2f   :  { %151 = vmatpush.msra.mxu1 %v78_v58  ;;  %129 = vmatmul.f32.vlgmr.msra.gmra.mxu0 %v572_v27  ;;  %v303_v36 = vld [vmem:[#allocation9 + $0x120] sm:$0xff]  ;;  %v301_v38 = vld [vmem:[#allocation9 + $0x110] sm:$0xff]  ;;  %v300_v39 = vld [vmem:[#allocation9 + $0x108] sm:$0xff] }
  0x30   :  { %152 = vmatmul.f32.vlgmr.msra.gmra.mxu1 %v76_v59  ;;  %273 = vmatpush.msrb.mxu0 %v230_v61  ;;  %v299_v40 = vld [vmem:[#allocation9 + $0x100] sm:$0xff] }
  0x31   :  { %374 = vmatpush.msrb.mxu2 %v230_v61  ;;  %315 = vmatpush.msrb.mxu1 %v314_v62  ;;  %v413_v44 = vld [vmem:[%s596_s2] ss:$0 sm:$0xff] }
  0x32   :  { %274 = vmatpush.msrb.mxu0 %v229_v0  ;;  %260 = vmatpush.msra.mxu3 %v239_v6 }
  0x33   :  { %375 = vmatpush.msrb.mxu2 %v229_v0  ;;  %316 = vmatpush.msrb.mxu1 %v313_v1  ;;  %v414_v0 = vld [vmem:[%s598_s4] ss:$0 sm:$0xff] }
  0x34   :  { %275 = vmatpush.msrb.mxu0 %v228_v3  ;;  %261 = vmatpush.msra.mxu3 %v238_v9 }
  0x35   :  { %376 = vmatpush.msrb.mxu2 %v228_v3  ;;  %317 = vmatpush.msrb.mxu1 %v312_v4 }
  0x36   :  { %197 = vmatmul.f32.gmra.mxu2 %v160_v5  ;;  %276 = vmatpush.msrb.mxu0 %v227_v8 }
  0x37   :  { %132 = vmatmul.f32.gmra.mxu0 %v574_v29  ;;  %377 = vmatpush.msrb.mxu2 %v227_v8 }
  0x38   :  { %155 = vmatmul.f32.gmra.mxu1 %v77_v7  ;;  %277 = vmatpush.msrb.mxu0 %v226_v10 }
  0x39   :  { %262 = vmatpush.msra.mxu3 %v237_v11  ;;  %378 = vmatpush.msrb.mxu2 %v226_v10 }
  0x3a   :  { %278 = vmatpush.msrb.mxu0 %v225_v12  ;;  %318 = vmatpush.msrb.mxu1 %v311_v18 }
  0x3b   :  { %263 = vmatpush.msra.mxu3 %v236_v13  ;;  %379 = vmatpush.msrb.mxu2 %v225_v12 }
  0x3c   :  { %279 = vmatpush.msrb.mxu0 %v224_v14  ;;  %319 = vmatpush.msrb.mxu1 %v310_v20 }
  0x3d   :  { %264 = vmatpush.msra.mxu3 %v235_v15  ;;  %380 = vmatpush.msrb.mxu2 %v224_v14 }
  0x3e   :  { %280 = vmatpush.msrb.mxu0 %v223_v17  ;;  %320 = vmatpush.msrb.mxu1 %v309_v22 }
  0x3f   :  { %265 = vmatpush.msra.mxu3 %v234_v16  ;;  %381 = vmatpush.msrb.mxu2 %v223_v17 }
  0x40   :  { %281 = vmatpush.msrb.mxu0 %v222_v19  ;;  %321 = vmatpush.msrb.mxu1 %v308_v24 }
  0x41   :  { %390 = vmatpush.msrb.mxu3 %v314_v62  ;;  %382 = vmatpush.msrb.mxu2 %v222_v19 }
  0x42   :  { %282 = vmatpush.msrb.mxu0 %v221_v21  ;;  %322 = vmatpush.msrb.mxu1 %v307_v26 }
  0x43   :  { %391 = vmatpush.msrb.mxu3 %v313_v1  ;;  %383 = vmatpush.msrb.mxu2 %v221_v21 }
  0x44   :  { %283 = vmatpush.msrb.mxu0 %v220_v23  ;;  %323 = vmatpush.msrb.mxu1 %v306_v30 }
  0x45   :  { %392 = vmatpush.msrb.mxu3 %v312_v4  ;;  %384 = vmatpush.msrb.mxu2 %v220_v23 }
  0x46   :  { %284 = vmatpush.msrb.mxu0 %v219_v25  ;;  %324 = vmatpush.msrb.mxu1 %v305_v32 }
  0x47   :  { %393 = vmatpush.msrb.mxu3 %v311_v18  ;;  %385 = vmatpush.msrb.mxu2 %v219_v25 }
  0x48   :  { %285 = vmatpush.msrb.mxu0 %v218_v28  ;;  %325 = vmatpush.msrb.mxu1 %v304_v34 }
  0x49   :  { %394 = vmatpush.msrb.mxu3 %v310_v20  ;;  %386 = vmatpush.msrb.mxu2 %v218_v28 }
  0x4a   :  { %286 = vmatpush.msrb.mxu0 %v217_v31  ;;  %326 = vmatpush.msrb.mxu1 %v303_v36 }
  0x4b   :  { %395 = vmatpush.msrb.mxu3 %v309_v22  ;;  %387 = vmatpush.msrb.mxu2 %v217_v31 }
  0x4c   :  { %287 = vmatpush.msrb.mxu0 %v216_v33  ;;  %327 = vmatpush.msrb.mxu1 %v302_v37 }
  0x4d   :  { %396 = vmatpush.msrb.mxu3 %v308_v24  ;;  %388 = vmatpush.msrb.mxu2 %v216_v33 }
  0x4e   :  { %288 = vmatpush.msrb.mxu0 %v215_v35  ;;  %328 = vmatpush.msrb.mxu1 %v301_v38 }
  0x4f   :  { %397 = vmatpush.msrb.mxu3 %v307_v26  ;;  %389 = vmatpush.msrb.mxu2 %v215_v35 }
  0x50   :  { %329 = vmatpush.msrb.mxu1 %v300_v39 }
  0x51   :  { %398 = vmatpush.msrb.mxu3 %v306_v30 }
  0x52   :  { %330 = vmatpush.msrb.mxu1 %v299_v40 }
  0x53   :  { %399 = vmatpush.msrb.mxu3 %v305_v32 }
  0x55   :  { %400 = vmatpush.msrb.mxu3 %v304_v34 }
  0x57   :  { %401 = vmatpush.msrb.mxu3 %v303_v36 }
  0x59   :  { %402 = vmatpush.msrb.mxu3 %v302_v37 }
  0x5b   :  { %403 = vmatpush.msrb.mxu3 %v301_v38 }
  0x5d   :  { %404 = vmatpush.msrb.mxu3 %v300_v39 }
  0x5f   :  { %405 = vmatpush.msrb.mxu3 %v299_v40 }
  0xac   :  { %v130_v41 = vpop.f32.mrf.mxu0 }
  0xad   :  { %v153_v42 = vpop.f32.mrf.mxu1 }
  0xae   :  { %v154_v43 = vadd.f32 %v153_v42, %v130_v41 }
  0xb1   :  { %v195_v45 = vpop.f32.mrf.mxu2 }
  0xb2   :  { %v201_v46 = vadd.f32 %v195_v45, %v154_v43 }
  0xb4   :  { %v207_v47 = vadd.f32 %v413_v44, %v201_v46  ;;  %v133_v48 = vpop.f32.mrf.mxu0 }
  0xb5   :  { %v156_v49 = vpop.f32.mrf.mxu1 }
  0xb6   :  { %v209_v50 = vmax.f32 %v207_v47, 0.0  ;;  %v157_v51 = vadd.f32 %v156_v49, %v133_v48 }
  0xb8   :  { %211 = vst [vmem:[#allocation3 + $0x1] sm:$0xff] %v209_v50  ;;  %266 = vmatmul.f32.vlgmr.msra.gmra.mxu3 %v209_v50 }
  0xb9   :  { %v198_v52 = vpop.f32.mrf.mxu2 }
  0xba   :  { %v202_v53 = vadd.f32 %v198_v52, %v157_v51 }
  0xbc   :  { %v208_v54 = vadd.f32 %v413_v44, %v202_v53 }
  0xbe   :  { %v210_v55 = vmax.f32 %v208_v54, 0.0 }
  0xbf   :  { %v213_v56 = vld [vmem:[#allocation3] sm:$0xff] }
  0xc0   :  { %212 = vst [vmem:[#allocation3 + $0x9] sm:$0xff] %v210_v55  ;;  %289 = vmatmul.f32.vlgmr.msrb.gmra.mxu0 %v213_v56  ;;  %269 = vmatmul.f32.gmra.mxu3 %v210_v55 }
  0xc7   :  { %v214_v57 = vld [vmem:[#allocation3 + $0x8] sm:$0xff] }
  0xc8   :  { %v296_v58 = vld [vmem:[#allocation3 + $0x2] sm:$0xff]  ;;  %v297_v59 = vld [vmem:[#allocation3 + $0xa] sm:$0xff]  ;;  %292 = vmatmul.f32.vlgmr.msrb.gmra.mxu2 %v214_v57 }
  0xc9   :  { %331 = vmatmul.f32.vlgmr.msrb.gmra.mxu1 %v296_v58  ;;  %334 = vmatmul.f32.vlgmr.msrb.gmra.mxu3 %v297_v59 }
 0x13b   :  { %v267_v60 = vpop.f32.mrf.mxu3 }
 0x13d   :  { %v290_v61 = vpop.f32.mrf.mxu0 }
 0x13e   :  { %v291_v63 = vadd.f32 %v290_v61, %v267_v60 }
 0x143   :  { %v270_v62 = vpop.f32.mrf.mxu3 }
 0x146   :  { %v332_v1 = vpop.f32.mrf.mxu1 }
 0x147   :  { %v338_v2 = vadd.f32 %v332_v1, %v291_v63 }
 0x149   :  { %v344_v3 = vadd.f32 %v414_v0, %v338_v2 }
 0x14b   :  { %v348_v4 = vadd.f32 %v344_v3, %v572_v27  ;;  %v293_v5 = vpop.f32.mrf.mxu2 }
 0x14c   :  { %v294_v7 = vadd.f32 %v293_v5, %v270_v62  ;;  %v335_v8 = vpop.f32.mrf.mxu3 }
 0x14d   :  { %v350_v6 = vmax.f32 %v348_v4, 0.0 }
 0x14e   :  { %v339_v9 = vadd.f32 %v335_v8, %v294_v7 }
 0x14f   :  { %352 = vst [vmem:[#allocation10] sm:$0xff] %v350_v6 }
 0x150   :  { %v345_v10 = vadd.f32 %v414_v0, %v339_v9 }
 0x152   :  { %v349_v11 = vadd.f32 %v345_v10, %v574_v29 }
 0x154   :  { %v351_v12 = vmax.f32 %v349_v11, 0.0 }
 0x156   :  { %353 = vst [vmem:[#allocation10 + $0x8] sm:$0xff] %v351_v12 }
 0x157   :  { %366 = dma.vmem_to_hbm [thread:$0]  %s359_s11, 256, %s361_s14, [#allocation6], %s518_s26, %s518_s26, %s519_s27  }
 0x158   :  { %515 = dma.done.wait [#allocation6], 256  }
 0x159   :  { %516 = vsyncadd [#allocation6], 4294967040 }
 0x15a   :  { %371 = vsyncpa [#allocation5], 1 }
 0x15b   :  { %372 = vsyncpa [#allocation8], 1 }
 0x15c   :  { %373 = vsyncpa [#allocation6], 1 }

</bundles_post_ra>
